<compile_context>
chip_gen: v5e
topology: v5e:2x2
jax: 0.10.0
libtpu: 0.0.40
codegen_flags: <defaults>
</compile_context>

<pallas_src>
import functools

import jax
import jax.numpy as jnp
from jax.experimental import pallas as pl
from jax.experimental.pallas import tpu as pltpu

A_W, B_W, C_W = 0.4, 0.3, 0.3          # omics mixing weights
BN_EPS = 1e-5


def _round_up(x, m):
    return (x + m - 1) // m * m


def _vmem_limit(resident_bytes):
    """Generation-aware VMEM request: footprint + slack, clamped to capacity."""
    try:
        cap = int(pltpu.get_tpu_info().vmem_capacity_bytes)
    except Exception:
        cap = 64 << 20                  # conservative (v7x per-TC capacity)
    want = max(int(resident_bytes) + (8 << 20), 32 << 20)
    return int(min(want, cap - (4 << 20)))


def _static_dims(in_feas, latent_dim):
    """All padded/tile sizes as Python ints (shared by prepare & forward)."""
    D1, D2, D3 = in_feas
    L = latent_dim
    Lp = _round_up(L, 128)
    max_d = max(D1, D2, D3)
    tk = min(2048, _round_up(max_d, 128))          # encoder K-tile
    Kp = _round_up(max_d, tk)
    d_pads = tuple(_round_up(d, 128) for d in (D1, D2, D3))
    d_cat = sum(d_pads)
    tn = d_cat if d_cat <= 4096 else 2048          # wide decoder output tile
    d_cat_p = _round_up(d_cat, tn)
    return Lp, tk, Kp, d_pads, d_cat, tn, d_cat_p


# --------------------------------------------------------------------------
# Kernel 1: encoder branch (Linear -> BatchNorm1d(batch stats) -> Sigmoid),
# K-streamed with a VMEM f32 accumulator.  grid = (branch, K-tiles).
# --------------------------------------------------------------------------
def _encoder_kernel(b_real, o_ref, w_ref, vec_ref, enc_ref, acc_ref):
    k = pl.program_id(1)

    @pl.when(k == 0)
    def _init():
        acc_ref[...] = jnp.zeros_like(acc_ref)

    # bf16 x bf16 -> f32 accumulation on the MXU.
    acc_ref[...] += jnp.dot(o_ref[...], w_ref[...],
                            preferred_element_type=jnp.float32)

    @pl.when(k == pl.num_programs(1) - 1)
    def _epilogue():
        vec = vec_ref[...]                              # (8, Lp) packed rows
        bias = vec[0:1, :]
        gamma = vec[1:2, :]
        beta = vec[2:3, :]
        mixmask = vec[3:4, :]          # mix weight on valid lanes, 0 on padding

        h = acc_ref[...] + bias                          # (Bp, Lp) f32

        # Mask zero-padded batch rows out of the BN statistics.
        row = jax.lax.broadcasted_iota(jnp.int32, h.shape, 0)
        bmask = (row < b_real).astype(jnp.float32)
        inv_n = 1.0 / float(b_real)

        mean = jnp.sum(h * bmask, axis=0, keepdims=True) * inv_n
        d = (h - mean) * bmask                           # mean-shifted (stable)
        var = jnp.sum(d * d, axis=0, keepdims=True) * inv_n   # biased var

        scale = gamma * jax.lax.rsqrt(var + BN_EPS)
        shift = beta - mean * scale
        enc_ref[...] = mixmask * jax.nn.sigmoid(h * scale + shift)


# --------------------------------------------------------------------------
# Kernel 2: fused decoder.  One lane-dense matmul, gridded over wide output
# tiles ("parallel" -> both TensorCores, weight tiles streamed from HBM).
# --------------------------------------------------------------------------
def _decoder_kernel(lat_ref, wd_ref, bd_ref, out_ref):
    out_ref[...] = (jnp.dot(lat_ref[...], wd_ref[...],
                            preferred_element_type=jnp.float32) + bd_ref[...])


# --------------------------------------------------------------------------
# One-time parameter preprocessing (hoisted out of the per-call hot path).
# --------------------------------------------------------------------------
def prepare_params(params, in_feas, latent_dim):
    D1, D2, D3 = in_feas
    L = latent_dim
    Lp, _tk, Kp, d_pads, _d_cat, _tn, d_cat_p = _static_dims(in_feas, latent_dim)

    def pad2(x, r, c):
        return jnp.pad(x, ((0, r - x.shape[0]), (0, c - x.shape[1])))

    # Encoder weights stacked per-branch, zero-padded to (Kp, Lp), bf16.
    w_stack = jnp.stack([pad2(params["w1"], Kp, Lp),
                         pad2(params["w2"], Kp, Lp),
                         pad2(params["w3"], Kp, Lp)]).astype(jnp.bfloat16)

    # Packed per-branch vectors: rows 0=bias, 1=gamma, 2=beta, 3=mix*lane_mask.
    vec = jnp.zeros((3, 8, Lp), jnp.float32)
    mix = (A_W, B_W, C_W)
    for i, (bn, gn, ben) in enumerate((("b1", "g1", "be1"),
                                       ("b2", "g2", "be2"),
                                       ("b3", "g3", "be3"))):
        vec = vec.at[i, 0, :L].set(params[bn])
        vec = vec.at[i, 1, :L].set(params[gn])
        vec = vec.at[i, 2, :L].set(params[ben])
        vec = vec.at[i, 3, :L].set(mix[i])

    # Fused decoder weight / bias (each branch 128-padded, total padded to tn).
    wd_cat = jnp.zeros((Lp, d_cat_p), jnp.float32)
    bd_cat = jnp.zeros((1, d_cat_p), jnp.float32)
    off = 0
    for wname, bname, d, dp in (("wd1", "bd1", D1, d_pads[0]),
                                ("wd2", "bd2", D2, d_pads[1]),
                                ("wd3", "bd3", D3, d_pads[2])):
        wd_cat = wd_cat.at[:L, off:off + d].set(params[wname])
        bd_cat = bd_cat.at[0, off:off + d].set(params[bname])
        off += dp
    wd_cat = wd_cat.astype(jnp.bfloat16)

    return {"w_stack": w_stack, "vec": vec, "wd_cat": wd_cat, "bd_cat": bd_cat}


# --------------------------------------------------------------------------
# Forward-pass builder.  All padded sizes are static Python ints.
# --------------------------------------------------------------------------
def make_mmae_forward(in_feas, latent_dim):
    D1, D2, D3 = in_feas
    L = latent_dim
    Lp, tk, Kp, d_pads, _d_cat, tn, d_cat_p = _static_dims(in_feas, latent_dim)
    D1p, D2p, D3p = d_pads
    n_k = Kp // tk
    n_j = d_cat_p // tn

    def forward(o1, o2, o3, prepped):
        B = o1.shape[0]
        Bp = _round_up(max(B, 16), 16)          # bf16 sublane packing (16 rows)

        def pad_act(x):
            return jnp.pad(x, ((0, Bp - x.shape[0]), (0, Kp - x.shape[1])))

        o_stack = jnp.stack([pad_act(o1), pad_act(o2),
                             pad_act(o3)]).astype(jnp.bfloat16)   # (3, Bp, Kp)

        # ---------------- encoder: grid (branch, K-tiles) -------------------
        enc_res = (2 * (Bp * tk * 2) + 2 * (tk * Lp * 2) + 2 * (8 * Lp * 4)
                   + 2 * (Bp * Lp * 4) + Bp * Lp * 4)
        enc_bytes = (3 * Bp * Kp * 2 + 3 * Kp * Lp * 2 + 3 * 8 * Lp * 4
                     + 3 * Bp * Lp * 4)
        enc_stack = pl.pallas_call(
            functools.partial(_encoder_kernel, B),
            out_shape=jax.ShapeDtypeStruct((3, Bp, Lp), jnp.float32),
            grid=(3, n_k),
            in_specs=[
                pl.BlockSpec((None, Bp, tk), lambda b, k: (b, 0, k)),
                pl.BlockSpec((None, tk, Lp), lambda b, k: (b, k, 0)),
                pl.BlockSpec((None, 8, Lp), lambda b, k: (b, 0, 0)),
            ],
            out_specs=pl.BlockSpec((None, Bp, Lp), lambda b, k: (b, 0, 0)),
            scratch_shapes=[pltpu.VMEM((Bp, Lp), jnp.float32)],
            compiler_params=pltpu.CompilerParams(
                dimension_semantics=("parallel", "arbitrary"),
                vmem_limit_bytes=_vmem_limit(enc_res)),
            cost_estimate=pl.CostEstimate(
                flops=2 * 3 * Bp * Kp * Lp + 12 * 3 * Bp * Lp,
                transcendentals=3 * Bp * Lp + 3 * Lp,
                bytes_accessed=enc_bytes),
        )(o_stack, prepped["w_stack"], prepped["vec"])

        # Weighted mix (mix weights already folded into each branch output).
        latent_p = enc_stack[0] + enc_stack[1] + enc_stack[2]     # (Bp, Lp) f32
        lat_bf16 = latent_p.astype(jnp.bfloat16)                  # decoder input

        # ---------------- decoder: grid over wide output tiles --------------
        dec_res = (2 * (Bp * Lp * 2) + 2 * (Lp * tn * 2) + 2 * (8 * tn * 4)
                   + 2 * (Bp * tn * 4))
        dec_bytes = Bp * Lp * 2 + Lp * d_cat_p * 2 + d_cat_p * 4 + Bp * d_cat_p * 4
        dcat = pl.pallas_call(
            _decoder_kernel,
            out_shape=jax.ShapeDtypeStruct((Bp, d_cat_p), jnp.float32),
            grid=(n_j,),
            in_specs=[pl.BlockSpec((Bp, Lp), lambda j: (0, 0)),
                      pl.BlockSpec((Lp, tn), lambda j: (0, j)),
                      pl.BlockSpec((1, tn), lambda j: (0, j))],
            out_specs=pl.BlockSpec((Bp, tn), lambda j: (0, j)),
            compiler_params=pltpu.CompilerParams(
                dimension_semantics=("parallel",),
                vmem_limit_bytes=_vmem_limit(dec_res)),
            cost_estimate=pl.CostEstimate(
                flops=2 * Bp * Lp * d_cat_p,
                transcendentals=0,
                bytes_accessed=dec_bytes),
        )(lat_bf16, prepped["wd_cat"], prepped["bd_cat"])

        # Strip padding.
        latent = latent_p[:B, :L]
        d1 = dcat[:B, 0:D1]
        d2 = dcat[:B, D1p:D1p + D2]
        d3 = dcat[:B, D1p + D2p:D1p + D2p + D3]
        return latent, d1, d2, d3

    return jax.jit(forward)


# --------------------------------------------------------------------------
# Synthetic init (mimics the torch init loop) + pure-JAX reference.
# --------------------------------------------------------------------------
def init_params(key, in_feas, latent):
    """Weights (incl. BN gamma) ~ N(0, 0.1), biases (incl. BN beta) = 0."""
    keys = jax.random.split(key, 9)
    D1, D2, D3 = in_feas
    L = latent

    def nrm(k, shape):
        return (0.1 * jax.random.normal(k, shape)).astype(jnp.float32)

    return {
        # encoder linears, stored transposed as (in, out)
        "w1": nrm(keys[0], (D1, L)), "b1": jnp.zeros((L,), jnp.float32),
        "w2": nrm(keys[1], (D2, L)), "b2": jnp.zeros((L,), jnp.float32),
        "w3": nrm(keys[2], (D3, L)), "b3": jnp.zeros((L,), jnp.float32),
        # batchnorm gamma / beta
        "g1": nrm(keys[3], (L,)), "be1": jnp.zeros((L,), jnp.float32),
        "g2": nrm(keys[4], (L,)), "be2": jnp.zeros((L,), jnp.float32),
        "g3": nrm(keys[5], (L,)), "be3": jnp.zeros((L,), jnp.float32),
        # decoder linears, stored as (in=L, out=Di)
        "wd1": nrm(keys[6], (L, D1)), "bd1": jnp.zeros((D1,), jnp.float32),
        "wd2": nrm(keys[7], (L, D2)), "bd2": jnp.zeros((D2,), jnp.float32),
        "wd3": nrm(keys[8], (L, D3)), "bd3": jnp.zeros((D3,), jnp.float32),
    }


def mmae_reference(o1, o2, o3, p):
    """Pure-JAX f32 reference (training-mode BatchNorm1d)."""
    def enc(x, w, b, g, be):
        h = x @ w + b
        m = jnp.mean(h, axis=0, keepdims=True)
        v = jnp.mean((h - m) ** 2, axis=0, keepdims=True)
        return jax.nn.sigmoid((h - m) / jnp.sqrt(v + BN_EPS) * g + be)

    e1 = enc(o1, p["w1"], p["b1"], p["g1"], p["be1"])
    e2 = enc(o2, p["w2"], p["b2"], p["g2"], p["be2"])
    e3 = enc(o3, p["w3"], p["b3"], p["g3"], p["be3"])
    lat = A_W * e1 + B_W * e2 + C_W * e3
    return (lat,
            lat @ p["wd1"] + p["bd1"],
            lat @ p["wd2"] + p["bd2"],
            lat @ p["wd3"] + p["bd3"])


if __name__ == "__main__":
    key = jax.random.PRNGKey(0)
    k_p, k1, k2, k3 = jax.random.split(key, 4)

    B = 8
    in_feas = [32, 24, 16]
    latent_dim = 16

    params = init_params(k_p, in_feas, latent_dim)
    prepped = prepare_params(params, in_feas, latent_dim)   # hoisted: done once
    forward = make_mmae_forward(in_feas, latent_dim)

    omics_1 = jax.random.normal(k1, (B, in_feas[0]), jnp.float32)
    omics_2 = jax.random.normal(k2, (B, in_feas[1]), jnp.float32)
    omics_3 = jax.random.normal(k3, (B, in_feas[2]), jnp.float32)

    outs = jax.block_until_ready(forward(omics_1, omics_2, omics_3, prepped))
    refs = mmae_reference(omics_1, omics_2, omics_3, params)

    for o, r in zip(outs, refs):
        assert o.shape == r.shape, (o.shape, r.shape)
        err = float(jnp.max(jnp.abs(o - r)))
        # bf16 matmul operands (f32 accumulation) -> loosened tolerance.
        assert err < 2e-2, f"mismatch vs reference: {err}"

    print("KERNEL_OK")
</pallas_src>

<mosaic_0001>
module attributes {stable_mosaic.version = 11 : i64} {
  func.func @_decoder_kernel(%arg0: i32, %arg1: memref<16x128xbf16, #tpu.memory_space<vmem>>, %arg2: memref<128x384xbf16, #tpu.memory_space<vmem>>, %arg3: memref<1x384xf32, #tpu.memory_space<vmem>>, %arg4: memref<16x384xf32, #tpu.memory_space<vmem>>) attributes {dimension_semantics = [#tpu.dimension_semantics<parallel>], iteration_bounds = array<i64: 1>, scalar_prefetch = 0 : i64, scratch_operands = 0 : i64, tpu.core_type = #tpu.core_type<tc>, window_params = [{pipeline_mode = #tpu.pipeline_mode<synchronous>, transform_indices = @transform_0, window_bounds = array<i64: 16, 128>}, {transform_indices = @transform_1, window_bounds = array<i64: 128, 384>}, {transform_indices = @transform_2, window_bounds = array<i64: 1, 384>}, {transform_indices = @transform_3, window_bounds = array<i64: 16, 384>}]} {
    %c0 = arith.constant 0 : index
    %c0_0 = arith.constant 0 : index
    %0 = vector.load %arg1[%c0, %c0_0] : memref<16x128xbf16, #tpu.memory_space<vmem>>, vector<16x128xbf16>
    %c0_1 = arith.constant 0 : index
    %c0_2 = arith.constant 0 : index
    %1 = vector.load %arg2[%c0_1, %c0_2] : memref<128x384xbf16, #tpu.memory_space<vmem>>, vector<128x384xbf16>
    %cst = arith.constant dense<0.000000e+00> : vector<16x384xf32>
    %2 = tpu.matmul %0, %1, %cst {dimension_numbers = #tpu.dot_dimension_numbers<[1], [0], [0], [1], [0, 0, 1, 1], [], []>} : vector<16x128xbf16>, vector<128x384xbf16>, vector<16x384xf32> -> vector<16x384xf32>
    %c0_3 = arith.constant 0 : index
    %c0_4 = arith.constant 0 : index
    %3 = vector.load %arg3[%c0_3, %c0_4] : memref<1x384xf32, #tpu.memory_space<vmem>>, vector<1x384xf32>
    %4 = vector.broadcast %3 : vector<1x384xf32> to vector<16x384xf32>
    %5 = arith.addf %2, %4 : vector<16x384xf32>
    %c0_5 = arith.constant 0 : index
    %c0_6 = arith.constant 0 : index
    %6 = vector.load %arg4[%c0_5, %c0_6] : memref<16x384xf32, #tpu.memory_space<vmem>>, vector<16x384xf32>
    tpu.vector_store %arg4[%c0_5, %c0_6], %5 {strides = array<i32>} : memref<16x384xf32, #tpu.memory_space<vmem>>, vector<16x384xf32>,
    return
  }
  func.func @transform_0(%arg0: i32) -> (i32, i32) {
    %c0_i32 = arith.constant 0 : i32
    %c0_i32_0 = arith.constant 0 : i32
    %c0_i32_1 = arith.constant 0 : i32
    return %c0_i32, %c0_i32_0 : i32, i32
  }
  func.func @transform_1(%arg0: i32) -> (i32, i32) {
    %c0_i32 = arith.constant 0 : i32
    %c0_i32_0 = arith.constant 0 : i32
    return %c0_i32, %arg0 : i32, i32
  }
  func.func @transform_2(%arg0: i32) -> (i32, i32) {
    %c0_i32 = arith.constant 0 : i32
    %c0_i32_0 = arith.constant 0 : i32
    return %c0_i32, %arg0 : i32, i32
  }
  func.func @transform_3(%arg0: i32) -> (i32, i32) {
    %c0_i32 = arith.constant 0 : i32
    %c0_i32_0 = arith.constant 0 : i32
    return %c0_i32, %arg0 : i32, i32
  }
}

module attributes {stable_mosaic.version = 11 : i64} {
  func.func @_encoder_kernel(%arg0: i32, %arg1: i32, %arg2: memref<1x16x128xbf16, #tpu.memory_space<vmem>>, %arg3: memref<1x128x128xbf16, #tpu.memory_space<vmem>>, %arg4: memref<1x8x128xf32, #tpu.memory_space<vmem>>, %arg5: memref<1x16x128xf32, #tpu.memory_space<vmem>>, %arg6: memref<16x128xf32, #tpu.memory_space<vmem>>) attributes {dimension_semantics = [#tpu.dimension_semantics<parallel>, #tpu.dimension_semantics<arbitrary>], iteration_bounds = array<i64: 3, 1>, scalar_prefetch = 0 : i64, scratch_operands = 1 : i64, tpu.core_type = #tpu.core_type<tc>, window_params = [{transform_indices = @transform_0, window_bounds = array<i64: 1, 16, 128>}, {transform_indices = @transform_1, window_bounds = array<i64: 1, 128, 128>}, {transform_indices = @transform_2, window_bounds = array<i64: 1, 8, 128>}, {transform_indices = @transform_3, window_bounds = array<i64: 1, 16, 128>}]} {
    %c0_i32 = arith.constant 0 : i32
    %0 = arith.cmpi eq, %arg1, %c0_i32 : i32
    %1 = arith.extui %0 : i1 to i32
    %c0_i32_0 = arith.constant 0 : i32
    %2 = arith.cmpi ne, %1, %c0_i32_0 : i32
    scf.if %2 {
      %cst_12 = arith.constant 0.000000e+00 : f32
      %14 = vector.broadcast %cst_12 : f32 to vector<16x128xf32>
      %c0_13 = arith.constant 0 : index
      %c0_14 = arith.constant 0 : index
      %15 = vector.load %arg6[%c0_13, %c0_14] : memref<16x128xf32, #tpu.memory_space<vmem>>, vector<16x128xf32>
      tpu.vector_store %arg6[%c0_13, %c0_14], %14 {strides = array<i32>} : memref<16x128xf32, #tpu.memory_space<vmem>>, vector<16x128xf32>,
    } else {
    }
    %c0 = arith.constant 0 : index
    %c0_1 = arith.constant 0 : index
    %3 = vector.load %arg6[%c0, %c0_1] : memref<16x128xf32, #tpu.memory_space<vmem>>, vector<16x128xf32>
    %c0_2 = arith.constant 0 : index
    %c0_3 = arith.constant 0 : index
    %c0_4 = arith.constant 0 : index
    %4 = vector.load %arg2[%c0_2, %c0_3, %c0_4] : memref<1x16x128xbf16, #tpu.memory_space<vmem>>, vector<1x16x128xbf16>
    %5 = vector.shape_cast %4 : vector<1x16x128xbf16> to vector<16x128xbf16>
    %c0_5 = arith.constant 0 : index
    %c0_6 = arith.constant 0 : index
    %c0_7 = arith.constant 0 : index
    %6 = vector.load %arg3[%c0_5, %c0_6, %c0_7] : memref<1x128x128xbf16, #tpu.memory_space<vmem>>, vector<1x128x128xbf16>
    %7 = vector.shape_cast %6 : vector<1x128x128xbf16> to vector<128x128xbf16>
    %cst = arith.constant dense<0.000000e+00> : vector<16x128xf32>
    %8 = tpu.matmul %5, %7, %cst {dimension_numbers = #tpu.dot_dimension_numbers<[1], [0], [0], [1], [0, 0, 1, 1], [], []>} : vector<16x128xbf16>, vector<128x128xbf16>, vector<16x128xf32> -> vector<16x128xf32>
    %9 = arith.addf %3, %8 : vector<16x128xf32>
    %c0_8 = arith.constant 0 : index
    %c0_9 = arith.constant 0 : index
    %10 = vector.load %arg6[%c0_8, %c0_9] : memref<16x128xf32, #tpu.memory_space<vmem>>, vector<16x128xf32>
    tpu.vector_store %arg6[%c0_8, %c0_9], %9 {strides = array<i32>} : memref<16x128xf32, #tpu.memory_space<vmem>>, vector<16x128xf32>,
    %c0_i32_10 = arith.constant 0 : i32
    %11 = arith.cmpi eq, %arg1, %c0_i32_10 : i32
    %12 = arith.extui %11 : i1 to i32
    %c0_i32_11 = arith.constant 0 : i32
    %13 = arith.cmpi ne, %12, %c0_i32_11 : i32
    scf.if %13 {
      %c0_12 = arith.constant 0 : index
      %c0_13 = arith.constant 0 : index
      %c0_14 = arith.constant 0 : index
      %14 = vector.load %arg4[%c0_12, %c0_13, %c0_14] : memref<1x8x128xf32, #tpu.memory_space<vmem>>, vector<1x8x128xf32>
      %15 = vector.shape_cast %14 : vector<1x8x128xf32> to vector<8x128xf32>
      %16 = vector.extract_strided_slice %15 {offsets = [0, 0], sizes = [1, 128], strides = [1, 1]} : vector<8x128xf32> to vector<1x128xf32>
      %17 = vector.extract_strided_slice %15 {offsets = [1, 0], sizes = [1, 128], strides = [1, 1]} : vector<8x128xf32> to vector<1x128xf32>
      %18 = vector.extract_strided_slice %15 {offsets = [2, 0], sizes = [1, 128], strides = [1, 1]} : vector<8x128xf32> to vector<1x128xf32>
      %19 = vector.extract_strided_slice %15 {offsets = [3, 0], sizes = [1, 128], strides = [1, 1]} : vector<8x128xf32> to vector<1x128xf32>
      %c0_15 = arith.constant 0 : index
      %c0_16 = arith.constant 0 : index
      %20 = vector.load %arg6[%c0_15, %c0_16] : memref<16x128xf32, #tpu.memory_space<vmem>>, vector<16x128xf32>
      %21 = vector.broadcast %16 : vector<1x128xf32> to vector<16x128xf32>
      %22 = arith.addf %20, %21 : vector<16x128xf32>
      %23 = tpu.iota {dimensions = array<i32: 0>} : vector<16x128xi32>
      %c8_i32 = arith.constant 8 : i32
      %24 = vector.broadcast %c8_i32 : i32 to vector<16x128xi32>
      %25 = arith.cmpi slt, %23, %24 : vector<16x128xi32>
      %26 = arith.extui %25 : vector<16x128xi1> to vector<16x128xi32>
      %27 = arith.sitofp %26 : vector<16x128xi32> to vector<16x128xf32>
      %28 = arith.mulf %22, %27 : vector<16x128xf32>
      %cst_17 = arith.constant dense<0.000000e+00> : vector<128xf32>
      %29 = vector.multi_reduction <add>, %28, %cst_17 [0] : vector<16x128xf32> to vector<128xf32>
      %30 = vector.shape_cast %29 : vector<128xf32> to vector<1x128xf32>
      %cst_18 = arith.constant 1.250000e-01 : f32
      %31 = vector.broadcast %cst_18 : f32 to vector<1x128xf32>
      %32 = arith.mulf %30, %31 : vector<1x128xf32>
      %33 = vector.broadcast %32 : vector<1x128xf32> to vector<16x128xf32>
      %34 = arith.subf %22, %33 : vector<16x128xf32>
      %35 = arith.mulf %34, %27 : vector<16x128xf32>
      %36 = arith.mulf %35, %35 : vector<16x128xf32>
      %cst_19 = arith.constant dense<0.000000e+00> : vector<128xf32>
      %37 = vector.multi_reduction <add>, %36, %cst_19 [0] : vector<16x128xf32> to vector<128xf32>
      %38 = vector.shape_cast %37 : vector<128xf32> to vector<1x128xf32>
      %cst_20 = arith.constant 1.250000e-01 : f32
      %39 = vector.broadcast %cst_20 : f32 to vector<1x128xf32>
      %40 = arith.mulf %38, %39 : vector<1x128xf32>
      %cst_21 = arith.constant 9.99999974E-6 : f32
      %41 = vector.broadcast %cst_21 : f32 to vector<1x128xf32>
      %42 = arith.addf %40, %41 : vector<1x128xf32>
      %43 = math.rsqrt %42 : vector<1x128xf32>
      %44 = arith.mulf %17, %43 : vector<1x128xf32>
      %45 = arith.mulf %32, %44 : vector<1x128xf32>
      %46 = arith.subf %18, %45 : vector<1x128xf32>
      %47 = vector.broadcast %44 : vector<1x128xf32> to vector<16x128xf32>
      %48 = arith.mulf %22, %47 : vector<16x128xf32>
      %49 = vector.broadcast %46 : vector<1x128xf32> to vector<16x128xf32>
      %50 = arith.addf %48, %49 : vector<16x128xf32>
      %51 = arith.negf %50 : vector<16x128xf32>
      %52 = math.exp %51 : vector<16x128xf32>
      %cst_22 = arith.constant 1.000000e+00 : f32
      %53 = vector.broadcast %cst_22 : f32 to vector<16x128xf32>
      %54 = arith.addf %53, %52 : vector<16x128xf32>
      %55 = arith.divf %53, %54 : vector<16x128xf32>
      %56 = vector.broadcast %19 : vector<1x128xf32> to vector<16x128xf32>
      %57 = arith.mulf %56, %55 : vector<16x128xf32>
      %c0_23 = arith.constant 0 : index
      %c0_24 = arith.constant 0 : index
      %c0_25 = arith.constant 0 : index
      %58 = vector.load %arg5[%c0_23, %c0_24, %c0_25] : memref<1x16x128xf32, #tpu.memory_space<vmem>>, vector<1x16x128xf32>
      %59 = vector.shape_cast %58 : vector<1x16x128xf32> to vector<16x128xf32>
      %60 = vector.shape_cast %57 : vector<16x128xf32> to vector<1x16x128xf32>
      tpu.vector_store %arg5[%c0_23, %c0_24, %c0_25], %60 {strides = array<i32>} : memref<1x16x128xf32, #tpu.memory_space<vmem>>, vector<1x16x128xf32>,
    } else {
    }
    return
  }
  func.func @transform_0(%arg0: i32, %arg1: i32) -> (i32, i32, i32) {
    %c0_i32 = arith.constant 0 : i32
    %c0_i32_0 = arith.constant 0 : i32
    return %arg0, %c0_i32, %arg1 : i32, i32, i32
  }
  func.func @transform_1(%arg0: i32, %arg1: i32) -> (i32, i32, i32) {
    %c0_i32 = arith.constant 0 : i32
    %c0_i32_0 = arith.constant 0 : i32
    return %arg0, %arg1, %c0_i32 : i32, i32, i32
  }
  func.func @transform_2(%arg0: i32, %arg1: i32) -> (i32, i32, i32) {
    %c0_i32 = arith.constant 0 : i32
    %c0_i32_0 = arith.constant 0 : i32
    %c0_i32_1 = arith.constant 0 : i32
    return %arg0, %c0_i32, %c0_i32_0 : i32, i32, i32
  }
  func.func @transform_3(%arg0: i32, %arg1: i32) -> (i32, i32, i32) {
    %c0_i32 = arith.constant 0 : i32
    %c0_i32_0 = arith.constant 0 : i32
    %c0_i32_1 = arith.constant 0 : i32
    return %arg0, %c0_i32, %c0_i32_0 : i32, i32, i32
  }
}

</mosaic_0001>

<bundles_post_ra>
// kernel: forward.3
= control target key start
LH: loop header
LB: loop body
LE: loop exit
PB: predicated region body
PF: predicated region fallthrough
CT: control target
= control target key end

     0   :  { %s555_s1 = inlined_call_operand.vmem [shape: bf16[128,384], index: 1, kind: input, shape index: {}]   ;;  %s556_s0 = inlined_call_operand.vmem [shape: bf16[16,128], index: 0, kind: input, shape index: {}]   ;;  %s557_s2 = inlined_call_operand.vmem [shape: f32[1,384], index: 2, kind: input, shape index: {}]   ;;  %s558_s3 = inlined_call_operand.vmem [shape: f32[16,384], index: 3, kind: output, shape index: {}]  }
   0x1   :  { %v332_v0 = vld [vmem:[%s555_s1 + $0xa8] sm:$0xf]  ;;  %v365_v1 = vld [vmem:[%s555_s1 + $0xb0] sm:$0xf0]  ;;  %v364_v2 = vld [vmem:[%s555_s1 + $0xac] sm:$0xf] }
   0x2   :  { %v333_v3 = vor.u32 %v365_v1, %v332_v0  ;;  %v334_v4 = vld [vmem:[%s555_s1 + $0xb4] sm:$0xf0]  ;;  %v340_v5 = vld [vmem:[%s555_s1 + $0xb0] sm:$0xf]  ;;  %v366_v6 = vld [vmem:[%s555_s1 + $0xb8] sm:$0xf0] }
   0x3   :  { %v337_v7 = vor.u32 %v364_v2, %v334_v4  ;;  %v341_v8 = vor.u32 %v366_v6, %v340_v5  ;;  %v320_v9 = vld [vmem:[%s555_s1 + $0x90] sm:$0xf]  ;;  %v362_v10 = vld [vmem:[%s555_s1 + $0x98] sm:$0xf0]  ;;  %v361_v11 = vld [vmem:[%s555_s1 + $0x94] sm:$0xf] }
   0x4   :  { %190 = vmatpush.bf16.msra.mxu0 %v333_v3  ;;  %v321_v12 = vor.u32 %v362_v10, %v320_v9  ;;  %v322_v13 = vld [vmem:[%s555_s1 + $0x9c] sm:$0xf0]  ;;  %v328_v14 = vld [vmem:[%s555_s1 + $0x98] sm:$0xf]  ;;  %v363_v15 = vld [vmem:[%s555_s1 + $0xa0] sm:$0xf0] }
   0x5   :  { %204 = vmatpush.bf16.msra.mxu1 %v337_v7  ;;  %218 = vmatpush.bf16.msra.mxu2 %v341_v8  ;;  %v325_v16 = vor.u32 %v361_v11, %v322_v13  ;;  %v329_v17 = vor.u32 %v363_v15, %v328_v14  ;;  %v308_v18 = vld [vmem:[%s555_s1 + $0x78] sm:$0xf]  ;;  %v359_v19 = vld [vmem:[%s555_s1 + $0x80] sm:$0xf0]  ;;  %v358_v20 = vld [vmem:[%s555_s1 + $0x7c] sm:$0xf] }
   0x6   :  { %v310_v21 = vld [vmem:[%s555_s1 + $0x84] sm:$0xf0]  ;;  %v316_v22 = vld [vmem:[%s555_s1 + $0x80] sm:$0xf]  ;;  %v360_v23 = vld [vmem:[%s555_s1 + $0x88] sm:$0xf0]  ;;  %v309_v24 = vor.u32 %v359_v19, %v308_v18 }
   0x7   :  { %v313_v25 = vor.u32 %v358_v20, %v310_v21  ;;  %v317_v26 = vor.u32 %v360_v23, %v316_v22  ;;  %v296_v27 = vld [vmem:[%s555_s1 + $0x60] sm:$0xf]  ;;  %v356_v28 = vld [vmem:[%s555_s1 + $0x68] sm:$0xf0]  ;;  %v355_v29 = vld [vmem:[%s555_s1 + $0x64] sm:$0xf] }
   0x8   :  { %191 = vmatpush.bf16.msra.mxu0 %v321_v12  ;;  %v298_v30 = vld [vmem:[%s555_s1 + $0x6c] sm:$0xf0]  ;;  %v304_v31 = vld [vmem:[%s555_s1 + $0x68] sm:$0xf]  ;;  %v357_v32 = vld [vmem:[%s555_s1 + $0x70] sm:$0xf0]  ;;  %v297_v33 = vor.u32 %v356_v28, %v296_v27 }
   0x9   :  { %205 = vmatpush.bf16.msra.mxu1 %v325_v16  ;;  %219 = vmatpush.bf16.msra.mxu2 %v329_v17  ;;  %v301_v34 = vor.u32 %v355_v29, %v298_v30  ;;  %v305_v35 = vor.u32 %v357_v32, %v304_v31  ;;  %v284_v36 = vld [vmem:[%s555_s1 + $0x48] sm:$0xf]  ;;  %v353_v37 = vld [vmem:[%s555_s1 + $0x50] sm:$0xf0]  ;;  %v352_v38 = vld [vmem:[%s555_s1 + $0x4c] sm:$0xf] }
   0xa   :  { %v286_v39 = vld [vmem:[%s555_s1 + $0x54] sm:$0xf0]  ;;  %v292_v40 = vld [vmem:[%s555_s1 + $0x50] sm:$0xf]  ;;  %v354_v41 = vld [vmem:[%s555_s1 + $0x58] sm:$0xf0]  ;;  %v285_v42 = vor.u32 %v353_v37, %v284_v36 }
   0xb   :  { %v289_v43 = vor.u32 %v352_v38, %v286_v39  ;;  %v293_v44 = vor.u32 %v354_v41, %v292_v40  ;;  %v272_v45 = vld [vmem:[%s555_s1 + $0x30] sm:$0xf]  ;;  %v350_v46 = vld [vmem:[%s555_s1 + $0x38] sm:$0xf0]  ;;  %v349_v47 = vld [vmem:[%s555_s1 + $0x34] sm:$0xf] }
   0xc   :  { %192 = vmatpush.bf16.msra.mxu0 %v309_v24  ;;  %v274_v48 = vld [vmem:[%s555_s1 + $0x3c] sm:$0xf0]  ;;  %v280_v49 = vld [vmem:[%s555_s1 + $0x38] sm:$0xf]  ;;  %v351_v50 = vld [vmem:[%s555_s1 + $0x40] sm:$0xf0]  ;;  %v273_v51 = vor.u32 %v350_v46, %v272_v45 }
   0xd   :  { %206 = vmatpush.bf16.msra.mxu1 %v313_v25  ;;  %220 = vmatpush.bf16.msra.mxu2 %v317_v26  ;;  %v277_v52 = vor.u32 %v349_v47, %v274_v48  ;;  %v281_v53 = vor.u32 %v351_v50, %v280_v49  ;;  %v260_v54 = vld [vmem:[%s555_s1 + $0x18] sm:$0xf]  ;;  %v347_v55 = vld [vmem:[%s555_s1 + $0x20] sm:$0xf0]  ;;  %v346_v56 = vld [vmem:[%s555_s1 + $0x1c] sm:$0xf] }
   0xe   :  { %v262_v57 = vld [vmem:[%s555_s1 + $0x24] sm:$0xf0]  ;;  %v268_v58 = vld [vmem:[%s555_s1 + $0x20] sm:$0xf]  ;;  %v348_v59 = vld [vmem:[%s555_s1 + $0x28] sm:$0xf0]  ;;  %v261_v60 = vor.u32 %v347_v55, %v260_v54 }
   0xf   :  { %v265_v61 = vor.u32 %v346_v56, %v262_v57  ;;  %v269_v62 = vor.u32 %v348_v59, %v268_v58  ;;  %v248_v63 = vld [vmem:[%s555_s1] sm:$0xf]  ;;  %v344_v0 = vld [vmem:[%s555_s1 + $0x8] sm:$0xf0]  ;;  %v343_v1 = vld [vmem:[%s555_s1 + $0x4] sm:$0xf] }
  0x10   :  { %193 = vmatpush.bf16.msra.mxu0 %v297_v33  ;;  %v250_v2 = vld [vmem:[%s555_s1 + $0xc] sm:$0xf0]  ;;  %v256_v3 = vld [vmem:[%s555_s1 + $0x8] sm:$0xf]  ;;  %v345_v4 = vld [vmem:[%s555_s1 + $0x10] sm:$0xf0]  ;;  %v249_v5 = vor.u32 %v344_v0, %v248_v63 }
  0x11   :  { %207 = vmatpush.bf16.msra.mxu1 %v301_v34  ;;  %221 = vmatpush.bf16.msra.mxu2 %v305_v35  ;;  %v253_v6 = vor.u32 %v343_v1, %v250_v2  ;;  %v257_v7 = vor.u32 %v345_v4, %v256_v3  ;;  %v342_v8 = vld [vmem:[%s556_s0] sm:$0xff] }
  0x12   :  { %v48_v9 = vld [vmem:[%s557_s2] sm:$0x7] }
  0x13   :  { %v50_v10 = vperm.slane %v48_v9, 0  ;;  %v51_v11 = vperm.slane %v48_v9, 1  ;;  %v52_v16 = vperm.slane %v48_v9, 2 }
  0x14   :  { %194 = vmatpush.bf16.msra.mxu0 %v285_v42 }
  0x15   :  { %208 = vmatpush.bf16.msra.mxu1 %v289_v43  ;;  %222 = vmatpush.bf16.msra.mxu2 %v293_v44 }
  0x18   :  { %195 = vmatpush.bf16.msra.mxu0 %v273_v51 }
  0x19   :  { %209 = vmatpush.bf16.msra.mxu1 %v277_v52  ;;  %223 = vmatpush.bf16.msra.mxu2 %v281_v53 }
  0x1c   :  { %196 = vmatpush.bf16.msra.mxu0 %v261_v60 }
  0x1d   :  { %210 = vmatpush.bf16.msra.mxu1 %v265_v61  ;;  %224 = vmatpush.bf16.msra.mxu2 %v269_v62 }
  0x20   :  { %197 = vmatpush.bf16.msra.mxu0 %v249_v5 }
  0x21   :  { %211 = vmatpush.bf16.msra.mxu1 %v253_v6  ;;  %225 = vmatpush.bf16.msra.mxu2 %v257_v7 }
  0x23   :  { %198 = vmatmul.bf16.vlgmr.msra.gmra.mxu0 %v342_v8 }
  0x24   :  { %212 = vmatmul.bf16.vlgmr.msra.gmra.mxu1 %v342_v8  ;;  %226 = vmatmul.bf16.vlgmr.msra.gmra.mxu2 %v342_v8 }
  0xa0   :  { %v199_v12 = vpop.f32.mrf.mxu0 }
  0xa1   :  { %v200_v13 = vadd.f32 %v199_v12, %v50_v10  ;;  %v213_v14 = vpop.f32.mrf.mxu1 }
  0xa2   :  { %v214_v15 = vadd.f32 %v213_v14, %v51_v11 }
  0xa3   :  { %232 = vst [vmem:[%s558_s3] sm:$0xff] %v200_v13 }
  0xa4   :  { %233 = vst [vmem:[%s558_s3 + $0x8] sm:$0xff] %v214_v15 }
  0xa7   :  { %v227_v17 = vpop.f32.mrf.mxu2 }
  0xa8   :  { %v228_v18 = vadd.f32 %v227_v17, %v52_v16  ;;  %v201_v19 = vpop.f32.mrf.mxu0 }
  0xa9   :  { %v202_v20 = vadd.f32 %v201_v19, %v50_v10  ;;  %v215_v21 = vpop.f32.mrf.mxu1 }
  0xaa   :  { %234 = vst [vmem:[%s558_s3 + $0x10] sm:$0xff] %v228_v18  ;;  %v216_v22 = vadd.f32 %v215_v21, %v51_v11 }
  0xab   :  { %235 = vst [vmem:[%s558_s3 + $0x18] sm:$0xff] %v202_v20 }
  0xac   :  { %236 = vst [vmem:[%s558_s3 + $0x20] sm:$0xff] %v216_v22 }
  0xaf   :  { %v229_v23 = vpop.f32.mrf.mxu2 }
  0xb0   :  { %v230_v24 = vadd.f32 %v229_v23, %v52_v16 }
  0xb2   :  { %237 = vst [vmem:[%s558_s3 + $0x28] sm:$0xff] %v230_v24 }

// kernel: forward.2
= control target key start
LH: loop header
LB: loop body
LE: loop exit
PB: predicated region body
PF: predicated region fallthrough
CT: control target
= control target key end

     0   :  { %8 = vsyncpa [#allocation4], 0  ;;  %s913_s0 = inlined_call_operand.vmem [shape: bf16[3,16,128], index: 0, kind: input, shape index: {}]   ;;  %s914_s1 = inlined_call_operand.hbm [shape: bf16[3,128,128], index: 1, kind: input, shape index: {}]   ;;  %s915_s2 = inlined_call_operand.vmem [shape: f32[3,8,128], index: 2, kind: input, shape index: {}]   ;;  %s916_s3 = inlined_call_operand.vmem [shape: f32[3,16,128], index: 3, kind: output, shape index: {}]  }
   0x1   :  { %10 = vsyncpa [#allocation4 + $0x1], 0  ;;  %s809_s12 = smov 0   ;;  %s811_s13 = smov 0  }
   0x2   :  { %s813_s14 = smov 0   ;;  %s815_s15 = smov 0  }
   0x3   :  { %s817_s16 = smov 0   ;;  %s819_s17 = smov 0  }
   0x4 LB: > { %s572_s18 = sadd.s32 4294967295, %s785_s17   ;;  %s28_s19 = sadd.s32 1, %s781_s16  ;;  %s785_s17 = sphi %s819_s17, %s16_s17   ;;  %s781_s16 = sphi %s817_s16, %s923_s16   ;;  %s777_s15 = sphi %s815_s15, %s922_s15   ;;  %s773_s14 = sphi %s813_s14, %s921_s14   ;;  %s769_s13 = sphi %s811_s13, %s920_s13   ;;  %s765_s12 = sphi %s809_s12, %s919_s12  }
   0x5   : > { %p30_p0 = scmp.ge.s32.totalorder %s28_s19, 3  ;;  %s65_s20 = sadd.s32 1, %s773_s14 }
   0x6   : > { %p72_p1 = scmp.ne.s32.totalorder %s773_s14, %s769_s13  ;;  %p73_p2 = scmp.eq.s32.totalorder %s785_s17, 0 }
   0x7   : > { %s925_s19 = smov (%p30_p0, %s28_s19), 0  ;;  %p78_p4 = scmp.ne.s32.totalorder %s769_s13, %s765_s12 }
   0x8   : > { %p845_p3 = por %p73_p2, %p72_p1  ;;  %s60_s22 = ssub.s32 %s781_s16, %s925_s19 }
   0x9   : > { %p79_p5 = scmp.eq.s32.totalorder %s572_s18, 0  ;;  %p63_p6 = scmp.eq.s32.totalorder %s60_s22, 0 }
   0xa   : > { %p644_p8 = scmp.lt.s32.totalorder %s785_s17, 3  ;;  %s165_s25 = sand.u32 1, %s773_s14  }
   0xb   : > { %p852_p7 = por %p79_p5, %p78_p4  ;;  %s626_s26 = sshll.u32 %s781_s16, 6 }
   0xc   : > { %s858_s24 = scalar_select %p63_p6, %s773_s14, %s65_s20  }
   0xd   : > { %s576_s27 = sshll.u32 %s165_s25, 6  ;;  %s176_s30 = scalar_lea.hbm %s914_s1, %s626_s26 }
   0xe   : > { %s177_s4 = sshll.u32 %s176_s30, 4  ;;  %s169_s5 = scalar_lea.vmem [#allocation3], %s576_s27  ;;  %s178_s4 = int_to_ptr.hbm [resolvable:$true] %s177_s4 }
   0xf   : > { %s179_s6 = sshll.u32 %s169_s5, 4  ;;  %p641_p9 = pnand %p644_p8, %p845_p3  ;;  %s180_s6 = int_to_ptr.vmem [resolvable:$true] %s179_s6 }
  0x10   : > { %p579_p10 = scmp.ge.s32.totalorder %s785_s17, 1  ;;  %p194_p11 = scmp.lt.s32.totalorder %s785_s17, 4 }
  0x11   : > { %s166_s7 = scalar_lea.sflag [#allocation4], %s165_s25  ;;  %s787_s8 = smov 64  }
  0x12   : > { %s788_s9 = smov 4   ;;  %p195_p12 = pnand %p579_p10, %p194_p11 }
  0x13   : > { %643 = dma.hbm_to_vmem [thread:$0]  (!%p641_p9), %s178_s4, 1024, %s180_s6, %s166_s7, %s787_s8, %s787_s8, %s788_s9  }
  0x14   : > { %198 = sbr.rel (%p195_p12) target bundleno = 298 (0x12a), region = 32  ;;  %s200_s10 = sand.u32 (!%p195_p12), 1, %s769_s13  }
  0x15   : > { %s580_s11 = sshll.u32 (!%p195_p12), %s200_s10, 6  ;;  %s201_s12 = scalar_lea.sflag (!%p195_p12), [#allocation4], %s200_s10 }
  0x16   : > { %s204_s18 = scalar_lea.vmem (!%p195_p12), [#allocation3], %s580_s11 }
  0x19   : > { %760 = dma.done.wait (%p852_p7), %s201_s12, 1024  }
  0x1a   : > { %762 = vsyncadd (%p852_p7), %s201_s12, 4294966272  ;;  %v637_v0 = vld [vmem:[%s204_s18 + $0x38] sm:$0xff]  ;;  %v636_v1 = vld [vmem:[%s204_s18 + $0x30] sm:$0xff]  ;;  %p240_p13 = scmp.lt.s32.totalorder %s777_s15, 2 }
  0x1b   : > { %338 = vmatpush.bf16.msra.mxu0 %v637_v0  ;;  %v635_v2 = vld [vmem:[%s204_s18 + $0x28] sm:$0xff]  ;;  %v634_v3 = vld [vmem:[%s204_s18 + $0x20] sm:$0xff]  ;;  %v633_v4 = vld [vmem:[%s204_s18 + $0x18] sm:$0xff] }
  0x1c   : > { %v632_v5 = vld [vmem:[%s204_s18 + $0x10] sm:$0xff]  ;;  %s927_s15 = smov (!%p240_p13, %s777_s15), 2  ;;  %v631_v6 = vld [vmem:[%s204_s18 + $0x8] sm:$0xff]  ;;  %v630_v7 = vld [vmem:[%s204_s18] sm:$0xff] }
  0x1d   : > { %s627_s20 = sshll.u32 %s927_s15, 3  ;;  %s628_s28 = sshll.u32 %s927_s15, 4 }
  0x1e   : > { %s247_s23 = scalar_lea.vmem %s913_s0, %s627_s20  ;;  %s252_s27 = scalar_lea.vmem %s915_s2, %s627_s20 }
  0x1f   : > { %339 = vmatpush.bf16.msra.mxu0 %v636_v1  ;;  %v629_v8 = vld [vmem:[%s247_s23] sm:$0xff]  ;;  %s257_s4 = scalar_lea.vmem %s916_s3, %s628_s28 }
  0x20   : > { %v885_v10 = vld [vmem:[%s252_s27] sm:$0xff] }
  0x21   : > { %v362_v11 = vperm.slane %v885_v10, 0 }
  0x23   : > { %340 = vmatpush.bf16.msra.mxu0 %v635_v2 }
  0x27   : > { %341 = vmatpush.bf16.msra.mxu0 %v634_v3 }
  0x2b   : > { %342 = vmatpush.bf16.msra.mxu0 %v633_v4 }
  0x2f   : > { %343 = vmatpush.bf16.msra.mxu0 %v632_v5 }
  0x33   : > { %344 = vmatpush.bf16.msra.mxu0 %v631_v6 }
  0x37   : > { %345 = vmatpush.bf16.msra.mxu0 %v630_v7 }
  0x3a   : > { %346 = vmatmul.bf16.vlgmr.msra.gmra.mxu0 %v629_v8 }
  0xb7   : > { %v347_v9 = vpop.f32.mrf.mxu0 }
  0xb8   : > { %v363_v14 = vadd.f32 %v362_v11, %v347_v9  ;;  %v459_v9 = vperm.slane %v885_v10, 3 }
  0xbf   : > { %v349_v12 = vpop.f32.mrf.mxu0 }
  0xc0   : > { %v364_v13 = vadd.f32 %v362_v11, %v349_v12 }
  0xc2   : > { %v375_v15 = vmul.f32 0.0, %v364_v13 }
  0xc4   : > { %v376_v16 = vadd.f32 %v375_v15, %v363_v14 }
  0xc6   : > { %v377_v17 = vrot.slane %v376_v16, 4 }
  0xc8   : > { %v378_v18 = vadd.f32 %v377_v17, %v376_v16 }
  0xca   : > { %v379_v19 = vrot.slane %v378_v18, 2 }
  0xcc   : > { %v380_v20 = vadd.f32 %v379_v19, %v378_v18 }
  0xce   : > { %v381_v21 = vrot.slane %v380_v20, 1 }
  0xd0   : > { %v382_v22 = vadd.f32 %v381_v21, %v380_v20 }
  0xd2   : > { %v383_v23 = vmul.f32 0.125, %v382_v22 }
  0xd4   : > { %v384_v24 = vsub.f32 %v363_v14, %v383_v23  ;;  %v385_v25 = vsub.f32 %v364_v13, %v383_v23 }
  0xd6   : > { %v387_v26 = vmul.f32 0.0, %v385_v25  ;;  %v388_v27 = vmul.f32 %v384_v24, %v384_v24 }
  0xd8   : > { %v389_v28 = vmul.f32 %v387_v26, %v387_v26 }
  0xda   : > { %v390_v29 = vadd.f32 %v389_v28, %v388_v27 }
  0xdc   : > { %v391_v30 = vrot.slane %v390_v29, 4 }
  0xde   : > { %v392_v31 = vadd.f32 %v391_v30, %v390_v29 }
  0xe0   : > { %v393_v32 = vrot.slane %v392_v31, 2 }
  0xe2   : > { %v394_v33 = vadd.f32 %v393_v32, %v392_v31 }
  0xe4   : > { %v395_v34 = vrot.slane %v394_v33, 1 }
  0xe6   : > { %v396_v35 = vadd.f32 %v395_v34, %v394_v33 }
  0xe8   : > { %v397_v36 = vmul.f32 0.125, %v396_v35 }
  0xea   : > { %v398_v37 = vadd.f32 1e-05, %v397_v36 }
  0xec   : > { %695 = vrsqrt.f32 %v398_v37  ;;  %vm405_vm1 = vweird.f32 %v398_v37 }
  0xf2   : > { %v696_v38 = vpop.eup %695 }
  0xf3   : > { %v400_v39 = vmul.f32 %v696_v38, %v398_v37  ;;  %vm406_vm0 = vweird.f32 %v696_v38 }
  0xf4   : > { %vm407_vm2 = vmor %vm405_vm1, %vm406_vm0 }
  0xf5   : > { %v401_v40 = vmul.f32 %v696_v38, %v400_v39 }
  0xf7   : > { %v402_v41 = vmul.f32 0.5, %v401_v40 }
  0xf9   : > { %v403_v42 = vsub.f32 1.5, %v402_v41 }
  0xfb   : > { %v404_v43 = vmul.f32 %v696_v38, %v403_v42 }
  0xfd   : > { %v408_v44 = vsel %vm407_vm2, %v696_v38, %v404_v43 }
  0xfe   : > { %v409_v45 = vmul.f32 %v408_v44, %v885_v10 }
 0x100   : > { %v410_v46 = vmul.f32 %v409_v45, %v383_v23  ;;  %v415_v48 = vperm.slane %v409_v45, 1 }
 0x102   : > { %v412_v47 = vrot.slane %v410_v46, 7  ;;  %v416_v50 = vmul.f32 %v415_v48, %v363_v14  ;;  %v417_v51 = vmul.f32 %v415_v48, %v364_v13 }
 0x104   : > { %v414_v49 = vsub.f32 %v885_v10, %v412_v47 }
 0x106   : > { %v418_v52 = vperm.slane %v414_v49, 2 }
 0x108   : > { %v419_v53 = vadd.f32 %v418_v52, %v416_v50  ;;  %v420_v54 = vadd.f32 %v418_v52, %v417_v51 }
 0x10a   : > { %v622_v55 = vmul.f32 -1.442695, %v419_v53  ;;  %v623_v56 = vmul.f32 -1.442695, %v420_v54 }
 0x10c   : > { %697 = vpow2.f32 %v622_v55 }
 0x10d   : > { %699 = vpow2.f32 %v623_v56 }
 0x112   : > { %v698_v57 = vpop.eup %697 }
 0x113   : > { %v700_v58 = vpop.eup %699  ;;  %v427_v59 = vadd.f32 1.0, %v698_v57 }
 0x114   : > { %v428_v60 = vadd.f32 1.0, %v700_v58 }
 0x115   : > { %701 = vrcp.f32 %v427_v59  ;;  %v440_v2 = vand.u32 2147483648, %v427_v59  ;;  %v438_v5 = vand.u32 2147483647, %v427_v59  ;;  %vm434_vm5 = vweird.f32 %v427_v59 }
 0x116   : > { %703 = vrcp.f32 %v428_v60  ;;  %v455_v6 = vand.u32 2147483648, %v428_v60  ;;  %v453_v8 = vand.u32 2147483647, %v428_v60  ;;  %vm449_vm7 = vweird.f32 %v428_v60 }
 0x117   : > { %v441_v12 = vor.u32 1.1754944e-38, %v440_v2  ;;  %vm439_vm8 = vcmp.eq.f32.partialorder %v438_v5, 8.507059e+37 }
 0x118   : > { %v456_v15 = vor.u32 1.1754944e-38, %v455_v6  ;;  %vm454_vm10 = vcmp.eq.f32.partialorder %v453_v8, 8.507059e+37 }
 0x11b   : > { %v702_v61 = vpop.eup %701 }
 0x11c   : > { %v704_v62 = vpop.eup %703  ;;  %v430_v63 = vmul.f32 %v702_v61, %v427_v59  ;;  %vm435_vm3 = vweird.f32 %v702_v61 }
 0x11d   : > { %v445_v0 = vmul.f32 %v704_v62, %v428_v60  ;;  %vm450_vm4 = vweird.f32 %v704_v62  ;;  %vm436_vm6 = vmor %vm434_vm5, %vm435_vm3 }
 0x11e   : > { %v431_v1 = vsub.f32 1.0, %v430_v63  ;;  %vm451_vm9 = vmor %vm449_vm7, %vm450_vm4 }
 0x11f   : > { %v446_v3 = vsub.f32 1.0, %v445_v0 }
 0x120   : > { %v432_v4 = vmul.f32 %v702_v61, %v431_v1 }
 0x121   : > { %v447_v7 = vmul.f32 %v704_v62, %v446_v3 }
 0x122   : > { %v433_v11 = vadd.f32 %v702_v61, %v432_v4 }
 0x123   : > { %v448_v13 = vadd.f32 %v704_v62, %v447_v7 }
 0x124   : > { %v437_v14 = vsel %vm436_vm6, %v702_v61, %v433_v11 }
 0x125   : > { %v442_v16 = vsel %vm439_vm8, %v441_v12, %v437_v14  ;;  %v452_v17 = vsel %vm451_vm9, %v704_v62, %v448_v13 }
 0x126   : > { %v457_v18 = vsel %vm454_vm10, %v456_v15, %v452_v17  ;;  %v460_v19 = vmul.f32 %v459_v9, %v442_v16 }
 0x127   : > { %v461_v10 = vmul.f32 %v459_v9, %v457_v18 }
 0x128   : > { %462 = vst [vmem:[%s257_s4] sm:$0xff] %v460_v19 }
 0x129   : > { %463 = vst [vmem:[%s257_s4 + $0x8] sm:$0xff] %v461_v10 }
 0x12a PF: > { %s16_s17 = sadd.s32 1, %s785_s17   ;;  %s919_s12 = smov %s769_s13 }
 0x12b   : > { %p13_p0 = scmp.ge.s32.totalorder %s16_s17, 5   ;;  %s920_s13 = smov %s773_s14 }
 0x12c   : > { %s921_s14 = smov %s858_s24  ;;  %s922_s15 = smov %s781_s16 }
 0x12d   : > { %s923_s16 = smov %s925_s19  ;;  %15 = sbr.rel (!%p13_p0) target bundleno = 4 (0x4), region = 86 }
 0x132   :  { %485 = vsyncpa [#allocation4], 1 }
 0x133   :  { %487 = vsyncpa [#allocation4 + $0x1], 1 }

</bundles_post_ra>
